<compile_context>
chip_gen: v5e
topology: v5e:2x2
jax: 0.10.0
libtpu: 0.0.40
codegen_flags: <defaults>
</compile_context>

<pallas_src>
import functools

import jax
import jax.numpy as jnp
import numpy as np
from jax import lax
from jax.experimental import pallas as pl
from jax.experimental.pallas import tpu as pltpu

PATCH = 8
C_IN = 3
C_FEAT = 16
K_FLAT = C_IN * PATCH * PATCH        # 192 == decoder out-channels (8*8*3)


def _ae_relu_kernel(x_ref, we_ref, be_ref, wd_ref, bd_ref, o_ref):
    # x_ref:  (tm, 192)   flattened input patches (c, p, q order)
    # we_ref: (192, 16)   encoder Conv2d weight, transposed for patches @ We
    # be_ref: (1, 16)     encoder bias
    # wd_ref: (16, 192)   1x1 decoder Conv2d weight, transposed for feat @ Wd
    # bd_ref: (1, 192)    decoder bias (channel order == pixel-shuffle order)
    x = x_ref[...]
    feat = jnp.dot(x, we_ref[...], preferred_element_type=jnp.float32) + be_ref[...]
    feat = jnp.maximum(feat, 0.0)                       # ReLU (free VPU slot)
    rec = jnp.dot(feat, wd_ref[...], preferred_element_type=jnp.float32) + bd_ref[...]
    o_ref[...] = rec.astype(o_ref.dtype)


def _round_up(v, m):
    return (v + m - 1) // m * m


@functools.partial(jax.jit, static_argnames=("tm_max",))
def naive_ae_relu(x, w_enc, b_enc, w_dec, b_dec, *, tm_max=2048):
    """Forward pass of Naive_ae_relu.

    x:     (N, 3, H, W)      NCHW, H and W divisible by 8
    w_enc: (16, 3, 8, 8)     Conv2d(3, 16, k=8, s=8) weight (OIHW)
    b_enc: (16,)
    w_dec: (192, 16, 1, 1)   Conv2d(16, 192, k=1) weight (OIHW)
    b_dec: (192,)
    returns rec: (N, 3, H, W)
    """
    N, C, H, W = x.shape
    assert C == C_IN and H % PATCH == 0 and W % PATCH == 0
    Hp, Wp = H // PATCH, W // PATCH
    M = N * Hp * Wp

    # --- glue: extract non-overlapping 8x8 patches, flattened in (c, p, q) order ---
    patches = x.reshape(N, C_IN, Hp, PATCH, Wp, PATCH)
    patches = patches.transpose(0, 2, 4, 1, 3, 5)        # (N, Hp, Wp, c, p, q)
    patches = patches.reshape(M, K_FLAT)                 # (M, 192)

    # --- adaptive row tile: as large as possible up to tm_max (multiple of 8) ---
    tm = min(tm_max, _round_up(M, 8))
    Mp = _round_up(M, tm)
    if Mp != M:                                          # pad tail rows (sliced off later)
        patches = jnp.pad(patches, ((0, Mp - M), (0, 0)))
    grid = Mp // tm

    # --- weights / biases in matmul form (VMEM-resident across the whole grid) ---
    we = w_enc.reshape(C_FEAT, K_FLAT).T                 # (192, 16)
    be = b_enc.reshape(1, C_FEAT)                        # (1, 16)
    wd = w_dec.reshape(K_FLAT, C_FEAT).T                 # (16, 192)
    bd = b_dec.reshape(1, K_FLAT)                        # (1, 192)

    rec_patches = pl.pallas_call(
        _ae_relu_kernel,
        out_shape=jax.ShapeDtypeStruct((Mp, K_FLAT), x.dtype),
        grid_spec=pltpu.PrefetchScalarGridSpec(
            num_scalar_prefetch=0,
            grid=(grid,),
            in_specs=[
                pl.BlockSpec((tm, K_FLAT), lambda i: (i, 0)),
                pl.BlockSpec((K_FLAT, C_FEAT), lambda i: (0, 0)),
                pl.BlockSpec((1, C_FEAT), lambda i: (0, 0)),
                pl.BlockSpec((C_FEAT, K_FLAT), lambda i: (0, 0)),
                pl.BlockSpec((1, K_FLAT), lambda i: (0, 0)),
            ],
            out_specs=pl.BlockSpec((tm, K_FLAT), lambda i: (i, 0)),
        ),
        compiler_params=pltpu.CompilerParams(
            dimension_semantics=("parallel",),           # feeds both TCs on megacore/v7x
            vmem_limit_bytes=32 * 1024 * 1024,           # headroom for tm=2048 on v5e too
            allow_input_fusion=[True, True, True, True, True],
        ),
    )(patches, we, be, wd, bd)

    # --- glue: pixel-shuffle fold of the 192 decoder channels back into NCHW ---
    rec_patches = rec_patches[:M]
    rec = rec_patches.reshape(N, Hp, Wp, C_IN, PATCH, PATCH)
    rec = rec.transpose(0, 3, 1, 4, 2, 5)                # (N, c, Hp, p, Wp, q)
    return rec.reshape(N, C_IN, H, W)


def _reference(x, w_enc, b_enc, w_dec, b_dec):
    """Pure-JAX reference matching the PyTorch module semantics."""
    dn = ("NCHW", "OIHW", "NCHW")
    feat = lax.conv_general_dilated(
        x, w_enc, window_strides=(PATCH, PATCH), padding="VALID",
        dimension_numbers=dn) + b_enc[None, :, None, None]
    feat = jnp.maximum(feat, 0.0)
    dec = lax.conv_general_dilated(
        feat, w_dec, window_strides=(1, 1), padding="VALID",
        dimension_numbers=dn) + b_dec[None, :, None, None]
    # PixelShuffle(8): (N, 3*64, Hp, Wp) -> (N, 3, Hp*8, Wp*8)
    N, _, Hp, Wp = dec.shape
    dec = dec.reshape(N, C_IN, PATCH, PATCH, Hp, Wp)
    dec = dec.transpose(0, 1, 4, 2, 5, 3)                # (N, c, Hp, p, Wp, q)
    return dec.reshape(N, C_IN, Hp * PATCH, Wp * PATCH)


if __name__ == "__main__":
    key = jax.random.PRNGKey(0)
    k_x, k_we, k_be, k_wd, k_bd = jax.random.split(key, 5)

    # Small shapes consistent with the module: batch=2, 3 input channels, 32x32 images.
    N, H, W = 2, 32, 32
    x = jax.random.normal(k_x, (N, C_IN, H, W), dtype=jnp.float32)

    # Deterministic parameter init (PyTorch-ish uniform bounds).
    bnd_e = 1.0 / np.sqrt(C_IN * PATCH * PATCH)
    bnd_d = 1.0 / np.sqrt(C_FEAT)                        # 1x1 conv fan-in
    w_enc = jax.random.uniform(k_we, (C_FEAT, C_IN, PATCH, PATCH),
                               minval=-bnd_e, maxval=bnd_e, dtype=jnp.float32)
    b_enc = jax.random.uniform(k_be, (C_FEAT,), minval=-bnd_e, maxval=bnd_e,
                               dtype=jnp.float32)
    w_dec = jax.random.uniform(k_wd, (K_FLAT, C_FEAT, 1, 1),
                               minval=-bnd_d, maxval=bnd_d, dtype=jnp.float32)
    b_dec = jax.random.uniform(k_bd, (K_FLAT,), minval=-bnd_d, maxval=bnd_d,
                               dtype=jnp.float32)

    # 1) default config (single grid step at this size)
    rec = jax.block_until_ready(naive_ae_relu(x, w_enc, b_enc, w_dec, b_dec))
    ref = jax.block_until_ready(_reference(x, w_enc, b_enc, w_dec, b_dec))
    assert rec.shape == (N, C_IN, H, W)
    np.testing.assert_allclose(np.asarray(rec), np.asarray(ref), rtol=1e-4, atol=1e-4)

    # 2) multi-step grid + padded tail: 56x56 -> M=98 patches, tm=64 -> grid=2, 30 pad rows
    x2 = jax.random.normal(k_x, (N, C_IN, 56, 56), dtype=jnp.float32)
    rec2 = jax.block_until_ready(
        naive_ae_relu(x2, w_enc, b_enc, w_dec, b_dec, tm_max=64))
    ref2 = jax.block_until_ready(_reference(x2, w_enc, b_enc, w_dec, b_dec))
    np.testing.assert_allclose(np.asarray(rec2), np.asarray(ref2), rtol=1e-4, atol=1e-4)

    print("KERNEL_OK")
</pallas_src>

<mosaic_0001>
module attributes {stable_mosaic.version = 11 : i64} {
  func.func @_ae_relu_kernel(%arg0: i32, %arg1: memref<32x192xf32, #tpu.memory_space<vmem>>, %arg2: memref<192x16xf32, #tpu.memory_space<vmem>>, %arg3: memref<1x16xf32, #tpu.memory_space<vmem>>, %arg4: memref<16x192xf32, #tpu.memory_space<vmem>>, %arg5: memref<1x192xf32, #tpu.memory_space<vmem>>, %arg6: memref<32x192xf32, #tpu.memory_space<vmem>>) attributes {dimension_semantics = [#tpu.dimension_semantics<parallel>], iteration_bounds = array<i64: 1>, scalar_prefetch = 0 : i64, scratch_operands = 0 : i64, tpu.core_type = #tpu.core_type<tc>, window_params = [{transform_indices = @transform_0, window_bounds = array<i64: 32, 192>}, {pipeline_mode = #tpu.pipeline_mode<synchronous>, transform_indices = @transform_1, window_bounds = array<i64: 192, 16>}, {pipeline_mode = #tpu.pipeline_mode<synchronous>, transform_indices = @transform_2, window_bounds = array<i64: 1, 16>}, {pipeline_mode = #tpu.pipeline_mode<synchronous>, transform_indices = @transform_3, window_bounds = array<i64: 16, 192>}, {pipeline_mode = #tpu.pipeline_mode<synchronous>, transform_indices = @transform_4, window_bounds = array<i64: 1, 192>}, {transform_indices = @transform_5, window_bounds = array<i64: 32, 192>}]} {
    %c0 = arith.constant 0 : index
    %c0_0 = arith.constant 0 : index
    %0 = vector.load %arg1[%c0, %c0_0] : memref<32x192xf32, #tpu.memory_space<vmem>>, vector<32x192xf32>
    %c0_1 = arith.constant 0 : index
    %c0_2 = arith.constant 0 : index
    %1 = vector.load %arg2[%c0_1, %c0_2] : memref<192x16xf32, #tpu.memory_space<vmem>>, vector<192x16xf32>
    %cst = arith.constant dense<0.000000e+00> : vector<32x16xf32>
    %2 = tpu.matmul %0, %1, %cst {dimension_numbers = #tpu.dot_dimension_numbers<[1], [0], [0], [1], [0, 0, 1, 1], [], []>} : vector<32x192xf32>, vector<192x16xf32>, vector<32x16xf32> -> vector<32x16xf32>
    %c0_3 = arith.constant 0 : index
    %c0_4 = arith.constant 0 : index
    %3 = vector.load %arg3[%c0_3, %c0_4] : memref<1x16xf32, #tpu.memory_space<vmem>>, vector<1x16xf32>
    %4 = vector.broadcast %3 : vector<1x16xf32> to vector<32x16xf32>
    %5 = arith.addf %2, %4 : vector<32x16xf32>
    %cst_5 = arith.constant 0.000000e+00 : f32
    %6 = vector.broadcast %cst_5 : f32 to vector<32x16xf32>
    %7 = arith.maximumf %5, %6 : vector<32x16xf32>
    %c0_6 = arith.constant 0 : index
    %c0_7 = arith.constant 0 : index
    %8 = vector.load %arg4[%c0_6, %c0_7] : memref<16x192xf32, #tpu.memory_space<vmem>>, vector<16x192xf32>
    %cst_8 = arith.constant dense<0.000000e+00> : vector<32x192xf32>
    %9 = tpu.matmul %7, %8, %cst_8 {dimension_numbers = #tpu.dot_dimension_numbers<[1], [0], [0], [1], [0, 0, 1, 1], [], []>} : vector<32x16xf32>, vector<16x192xf32>, vector<32x192xf32> -> vector<32x192xf32>
    %c0_9 = arith.constant 0 : index
    %c0_10 = arith.constant 0 : index
    %10 = vector.load %arg5[%c0_9, %c0_10] : memref<1x192xf32, #tpu.memory_space<vmem>>, vector<1x192xf32>
    %11 = vector.broadcast %10 : vector<1x192xf32> to vector<32x192xf32>
    %12 = arith.addf %9, %11 : vector<32x192xf32>
    %c0_11 = arith.constant 0 : index
    %c0_12 = arith.constant 0 : index
    %13 = vector.load %arg6[%c0_11, %c0_12] : memref<32x192xf32, #tpu.memory_space<vmem>>, vector<32x192xf32>
    tpu.vector_store %arg6[%c0_11, %c0_12], %12 {strides = array<i32>} : memref<32x192xf32, #tpu.memory_space<vmem>>, vector<32x192xf32>,
    return
  }
  func.func @transform_0(%arg0: i32) -> (i32, i32) {
    %c0_i32 = arith.constant 0 : i32
    %c0_i32_0 = arith.constant 0 : i32
    return %arg0, %c0_i32 : i32, i32
  }
  func.func @transform_1(%arg0: i32) -> (i32, i32) {
    %c0_i32 = arith.constant 0 : i32
    %c0_i32_0 = arith.constant 0 : i32
    %c0_i32_1 = arith.constant 0 : i32
    return %c0_i32, %c0_i32_0 : i32, i32
  }
  func.func @transform_2(%arg0: i32) -> (i32, i32) {
    %c0_i32 = arith.constant 0 : i32
    %c0_i32_0 = arith.constant 0 : i32
    %c0_i32_1 = arith.constant 0 : i32
    return %c0_i32, %c0_i32_0 : i32, i32
  }
  func.func @transform_3(%arg0: i32) -> (i32, i32) {
    %c0_i32 = arith.constant 0 : i32
    %c0_i32_0 = arith.constant 0 : i32
    %c0_i32_1 = arith.constant 0 : i32
    return %c0_i32, %c0_i32_0 : i32, i32
  }
  func.func @transform_4(%arg0: i32) -> (i32, i32) {
    %c0_i32 = arith.constant 0 : i32
    %c0_i32_0 = arith.constant 0 : i32
    %c0_i32_1 = arith.constant 0 : i32
    return %c0_i32, %c0_i32_0 : i32, i32
  }
  func.func @transform_5(%arg0: i32) -> (i32, i32) {
    %c0_i32 = arith.constant 0 : i32
    %c0_i32_0 = arith.constant 0 : i32
    return %arg0, %c0_i32 : i32, i32
  }
}

</mosaic_0001>

<bundles_post_ra>
// kernel: naive_ae_relu.2
= control target key start
LH: loop header
LB: loop body
LE: loop exit
PB: predicated region body
PF: predicated region fallthrough
CT: control target
= control target key end

     0   :  { %vm82_vm0 = vcmask 523264   ;;  %vm167_vm1 = vcmask 130048   ;;  %s450_s0 = inlined_call_operand.vmem [shape: f32[32,192], index: 0, kind: input, shape index: {}]   ;;  %s451_s1 = inlined_call_operand.vmem [shape: f32[192,16], index: 1, kind: input, shape index: {}]   ;;  %s452_s2 = inlined_call_operand.vmem [shape: f32[1,192], index: 2, kind: input, shape index: {}]   ;;  %s453_s3 = inlined_call_operand.vmem [shape: f32[192,16,1,1], index: 3, kind: input, shape index: {}]   ;;  %s454_s4 = inlined_call_operand.vmem [shape: f32[16], index: 4, kind: input, shape index: {}]   ;;  %s455_s5 = inlined_call_operand.vmem [shape: f32[32,192], index: 5, kind: output, shape index: {}]  }
   0x1   :  { %v69_v0 = vld [vmem:[%s451_s1 + $0x78] sm:$0xff]  ;;  %v68_v1 = vld [vmem:[%s451_s1 + $0x70] sm:$0xff]  ;;  %v67_v2 = vld [vmem:[%s451_s1 + $0x68] sm:$0xff] }
   0x2   :  { %95 = vmatpush.msra.mxu0 %v69_v0  ;;  %v77_v3 = vld [vmem:[%s451_s1 + $0xb8] sm:$0xff]  ;;  %v66_v4 = vld [vmem:[%s451_s1 + $0x60] sm:$0xff]  ;;  %v76_v5 = vld [vmem:[%s451_s1 + $0xb0] sm:$0xff] }
   0x3   :  { %132 = vmatpush.msra.mxu1 %v77_v3  ;;  %v75_v6 = vld [vmem:[%s451_s1 + $0xa8] sm:$0xff]  ;;  %v65_v7 = vld [vmem:[%s451_s1 + $0x58] sm:$0xff]  ;;  %v74_v8 = vld [vmem:[%s451_s1 + $0xa0] sm:$0xff] }
   0x4   :  { %96 = vmatpush.msra.mxu0 %v68_v1  ;;  %v64_v9 = vld [vmem:[%s451_s1 + $0x50] sm:$0xff]  ;;  %v73_v10 = vld [vmem:[%s451_s1 + $0x98] sm:$0xff]  ;;  %v63_v11 = vld [vmem:[%s451_s1 + $0x48] sm:$0xff] }
   0x5   :  { %133 = vmatpush.msra.mxu1 %v76_v5  ;;  %v72_v12 = vld [vmem:[%s451_s1 + $0x90] sm:$0xff]  ;;  %v62_v13 = vld [vmem:[%s451_s1 + $0x40] sm:$0xff]  ;;  %v71_v14 = vld [vmem:[%s451_s1 + $0x88] sm:$0xff] }
   0x6   :  { %97 = vmatpush.msra.mxu0 %v67_v2  ;;  %v61_v15 = vld [vmem:[%s451_s1 + $0x38] sm:$0xff]  ;;  %v70_v16 = vld [vmem:[%s451_s1 + $0x80] sm:$0xff]  ;;  %v60_v17 = vld [vmem:[%s451_s1 + $0x30] sm:$0xff] }
   0x7   :  { %134 = vmatpush.msra.mxu1 %v75_v6  ;;  %v47_v18 = vld [vmem:[%s450_s0 + $0x8] sm:$0xff]  ;;  %v58_v20 = vld [vmem:[%s451_s1 + $0x20] sm:$0xff]  ;;  %v57_v21 = vld [vmem:[%s451_s1 + $0x18] sm:$0xff] }
   0x8   :  { %98 = vmatpush.msra.mxu0 %v66_v4  ;;  %v59_v19 = vld [vmem:[%s451_s1 + $0x28] sm:$0xff]  ;;  %v56_v22 = vld [vmem:[%s451_s1 + $0x10] sm:$0xff]  ;;  %v49_v23 = vld [vmem:[%s450_s0 + $0x18] sm:$0xff] }
   0x9   :  { %135 = vmatpush.msra.mxu1 %v74_v8  ;;  %v20_v24 = vld [vmem:[%s454_s4] sm:$0x1]  ;;  %v55_v25 = vld [vmem:[%s451_s1 + $0x8] sm:$0xff]  ;;  %v48_v29 = vld [vmem:[%s450_s0 + $0x10] sm:$0xff] }
   0xa   :  { %99 = vmatpush.msra.mxu0 %v65_v7  ;;  %23 = vst [vmem:[#allocation2] sm:$0x1] %v20_v24  ;;  %v54_v26 = vld [vmem:[%s451_s1] sm:$0xff]  ;;  %v51_v28 = vld [vmem:[%s450_s0 + $0x28] sm:$0xff]  ;;  %v53_v30 = vld [vmem:[%s450_s0 + $0x38] sm:$0xff] }
   0xb   :  { %136 = vmatpush.msra.mxu1 %v73_v10  ;;  %v46_v27 = vld [vmem:[%s450_s0] sm:$0xff]  ;;  %v52_v32 = vld [vmem:[%s450_s0 + $0x30] sm:$0xff]  ;;  %v252_v34 = vld [vmem:[%s453_s3 + $0x18] sm:$0xff] }
   0xc   :  { %100 = vmatpush.msra.mxu0 %v64_v9  ;;  %v50_v31 = vld [vmem:[%s450_s0 + $0x20] sm:$0xff]  ;;  %v251_v33 = vld [vmem:[%s453_s3 + $0x10] sm:$0xff]  ;;  %223 = vmatpush.msra.mxu3 %v252_v34  ;;  %v250_v36 = vld [vmem:[%s453_s3 + $0x8] sm:$0xff] }
   0xd   :  { %137 = vmatpush.msra.mxu1 %v72_v12  ;;  %194 = vmatpush.msra.mxu2 %v251_v33  ;;  %v24_v35 = vld [vmem:[%s453_s3] sm:$0xff] }
   0xe   :  { %101 = vmatpush.msra.mxu0 %v63_v11  ;;  %224 = vmatpush.msra.mxu3 %v250_v36  ;;  %v161_v58 = vld [vmem:[%s452_s2] sm:$0x3] }
   0xf   :  { %138 = vmatpush.msra.mxu1 %v71_v14  ;;  %195 = vmatpush.msra.mxu2 %v24_v35  ;;  %v163_v59 = vperm.slane %v161_v58, 0  ;;  %v164_v60 = vperm.slane %v161_v58, 1 }
  0x10   :  { %102 = vmatpush.msra.mxu0 %v62_v13 }
  0x11   :  { %139 = vmatpush.msra.mxu1 %v70_v16  ;;  %v265_v38 = vld [vmem:[#allocation2] ss:$0 sm:$0xff] }
  0x12   :  { %103 = vmatpush.msra.mxu0 %v61_v15  ;;  %253 = vmatmul.msk.f32.vlgmr.msra.gmra.mxu1 %vm82_vm0, %v47_v18 }
  0x14   :  { %104 = vmatpush.msra.mxu0 %v60_v17 }
  0x16   :  { %105 = vmatpush.msra.mxu0 %v59_v19 }
  0x18   :  { %106 = vmatpush.msra.mxu0 %v58_v20 }
  0x1a   :  { %107 = vmatpush.msra.mxu0 %v57_v21  ;;  %254 = vmatmul.msk.f32.gmra.mxu1 %vm82_vm0, %v49_v23 }
  0x1c   :  { %108 = vmatpush.msra.mxu0 %v56_v22 }
  0x1e   :  { %109 = vmatpush.msra.mxu0 %v55_v25 }
  0x20   :  { %110 = vmatpush.msra.mxu0 %v54_v26 }
  0x21   :  { %111 = vmatmul.f32.vlgmr.msra.gmra.mxu0 %v46_v27 }
  0x22   :  { %255 = vmatmul.msk.f32.gmra.mxu1 %vm82_vm0, %v51_v28 }
  0x29   :  { %114 = vmatmul.f32.gmra.mxu0 %v48_v29 }
  0x2a   :  { %256 = vmatmul.msk.f32.gmra.mxu1 %vm82_vm0, %v53_v30 }
  0x31   :  { %117 = vmatmul.f32.gmra.mxu0 %v50_v31 }
  0x39   :  { %120 = vmatmul.f32.gmra.mxu0 %v52_v32 }
  0x8f   :  { %v141_v37 = vpop.f32.mrf.mxu1 }
  0x97   :  { %v144_v42 = vpop.f32.mrf.mxu1 }
  0x9e   :  { %v112_v39 = vpop.f32.mrf.mxu0 }
  0x9f   :  { %v113_v40 = vadd.f32 %v265_v38, %v112_v39  ;;  %v147_v48 = vpop.f32.mrf.mxu1 }
  0xa1   :  { %v142_v41 = vadd.f32 %v141_v37, %v113_v40 }
  0xa3   :  { %v153_v43 = vmax.f32 %v142_v41, 0.0 }
  0xa5   :  { %257 = vmatmul.msk.f32.vlgmr.msra.gmra.mxu2 %vm167_vm1, %v153_v43  ;;  %261 = vmatmul.msk.f32.vlgmr.msra.gmra.mxu3 %vm167_vm1, %v153_v43 }
  0xa6   :  { %v115_v44 = vpop.f32.mrf.mxu0 }
  0xa7   :  { %v116_v45 = vadd.f32 %v265_v38, %v115_v44  ;;  %v150_v54 = vpop.f32.mrf.mxu1 }
  0xa9   :  { %v145_v46 = vadd.f32 %v144_v42, %v116_v45 }
  0xab   :  { %v154_v47 = vmax.f32 %v145_v46, 0.0 }
  0xad   :  { %258 = vmatmul.msk.f32.gmra.mxu2 %vm167_vm1, %v154_v47  ;;  %262 = vmatmul.msk.f32.gmra.mxu3 %vm167_vm1, %v154_v47 }
  0xae   :  { %v118_v49 = vpop.f32.mrf.mxu0 }
  0xaf   :  { %v119_v50 = vadd.f32 %v265_v38, %v118_v49 }
  0xb1   :  { %v148_v51 = vadd.f32 %v147_v48, %v119_v50 }
  0xb3   :  { %v155_v52 = vmax.f32 %v148_v51, 0.0 }
  0xb5   :  { %259 = vmatmul.msk.f32.gmra.mxu2 %vm167_vm1, %v155_v52  ;;  %263 = vmatmul.msk.f32.gmra.mxu3 %vm167_vm1, %v155_v52 }
  0xb6   :  { %v121_v53 = vpop.f32.mrf.mxu0 }
  0xb7   :  { %v122_v55 = vadd.f32 %v265_v38, %v121_v53 }
  0xb9   :  { %v151_v56 = vadd.f32 %v150_v54, %v122_v55 }
  0xbb   :  { %v156_v57 = vmax.f32 %v151_v56, 0.0 }
  0xbd   :  { %260 = vmatmul.msk.f32.gmra.mxu2 %vm167_vm1, %v156_v57  ;;  %264 = vmatmul.msk.f32.gmra.mxu3 %vm167_vm1, %v156_v57 }
 0x128   :  { %v197_v61 = vpop.f32.mrf.mxu2  ;;  %v226_v62 = vpop.f32.mrf.mxu3 }
 0x129   :  { %v198_v63 = vadd.f32 %v197_v61, %v163_v59  ;;  %v227_v0 = vadd.f32 %v226_v62, %v164_v60 }
 0x12b   :  { %238 = vst [vmem:[%s455_s5] sm:$0xff] %v198_v63 }
 0x12c   :  { %239 = vst.msk [vmem:[%s455_s5 + $0x8] sm:$0xff] %vm82_vm0, %v227_v0 }
 0x130   :  { %v200_v1 = vpop.f32.mrf.mxu2  ;;  %v229_v2 = vpop.f32.mrf.mxu3 }
 0x131   :  { %v201_v3 = vadd.f32 %v200_v1, %v163_v59  ;;  %v230_v4 = vadd.f32 %v229_v2, %v164_v60 }
 0x133   :  { %240 = vst [vmem:[%s455_s5 + $0x10] sm:$0xff] %v201_v3 }
 0x134   :  { %241 = vst.msk [vmem:[%s455_s5 + $0x18] sm:$0xff] %vm82_vm0, %v230_v4 }
 0x138   :  { %v203_v5 = vpop.f32.mrf.mxu2  ;;  %v232_v6 = vpop.f32.mrf.mxu3 }
 0x139   :  { %v204_v7 = vadd.f32 %v203_v5, %v163_v59  ;;  %v233_v8 = vadd.f32 %v232_v6, %v164_v60 }
 0x13b   :  { %242 = vst [vmem:[%s455_s5 + $0x20] sm:$0xff] %v204_v7 }
 0x13c   :  { %243 = vst.msk [vmem:[%s455_s5 + $0x28] sm:$0xff] %vm82_vm0, %v233_v8 }
 0x140   :  { %v206_v9 = vpop.f32.mrf.mxu2  ;;  %v235_v10 = vpop.f32.mrf.mxu3 }
 0x141   :  { %v207_v11 = vadd.f32 %v206_v9, %v163_v59  ;;  %v236_v12 = vadd.f32 %v235_v10, %v164_v60 }
 0x143   :  { %244 = vst [vmem:[%s455_s5 + $0x30] sm:$0xff] %v207_v11 }
 0x144   :  { %245 = vst.msk [vmem:[%s455_s5 + $0x38] sm:$0xff] %vm82_vm0, %v236_v12 }

</bundles_post_ra>
